<compile_context>
chip_gen: v7x
topology: tpu7x:2x2x1
jax: 0.10.0
libtpu: 0.0.40
codegen_flags: <defaults>
</compile_context>

<pallas_src>
import jax
import jax.numpy as jnp
from jax.experimental import pallas as pl
from jax.experimental.pallas import tpu as pltpu


def _round_up(x, m):
    return ((x + m - 1) // m) * m


def _compressed_linear_kernel(x_ref, svt_ref, bsv_ref, ut_ref, bu_ref, o_ref):
    # x_ref  : (TB, In_p)     compute dtype
    # svt_ref: (In_p, L_p)    compute dtype  (= linear_sv.weight^T, padded, resident)
    # bsv_ref: (1, L_p)       f32            (= linear_sv.bias, padded)
    # ut_ref : (L_p, Out_p)   compute dtype  (= linear_u.weight^T, padded, resident)
    # bu_ref : (1, Out_p)     f32            (= linear_u.bias, padded)
    # o_ref  : (TB, Out_p)    output dtype
    h = jnp.dot(x_ref[...], svt_ref[...], preferred_element_type=jnp.float32)
    h = h + bsv_ref[...]                      # bias added once per tile (no K-tiling here)
    y = jnp.dot(h.astype(ut_ref.dtype), ut_ref[...], preferred_element_type=jnp.float32)
    y = y + bu_ref[...]
    o_ref[...] = y.astype(o_ref.dtype)


def compressed_linear(x, sv_w, sv_b, u_w, u_b, *, tb=None, compute_dtype=jnp.bfloat16):
    """Fused (x @ SV^T + b_sv) @ U^T + b_u via a single pallas_call."""
    B, In = x.shape
    L, In2 = sv_w.shape
    Out, L2 = u_w.shape
    assert In == In2 and L == L2
    out_dtype = x.dtype

    # Lane-dense padding (full MXU occupancy, unmasked vst on the output).
    In_p = _round_up(In, 128)
    L_p = _round_up(L, 128)
    Out_p = _round_up(Out, 128)

    # Batch tile: multiple of 8 sublanes, capped so realistic batches give a multi-step
    # grid (DMA/compute overlap + megacore splitting). Ragged batches are zero-padded.
    if tb is None:
        tb = min(256, _round_up(B, 8))
    tb = max(8, _round_up(tb, 8))
    B_p = _round_up(B, tb)

    cdt = jnp.dtype(compute_dtype)
    x_p = jnp.zeros((B_p, In_p), compute_dtype).at[:B, :In].set(x.astype(compute_dtype))
    svt = jnp.zeros((In_p, L_p), compute_dtype).at[:In, :L].set(sv_w.T.astype(compute_dtype))
    ut = jnp.zeros((L_p, Out_p), compute_dtype).at[:L, :Out].set(u_w.T.astype(compute_dtype))
    bsv = jnp.zeros((1, L_p), jnp.float32).at[0, :L].set(sv_b.astype(jnp.float32))
    bu = jnp.zeros((1, Out_p), jnp.float32).at[0, :Out].set(u_b.astype(jnp.float32))

    cb = cdt.itemsize
    ob = jnp.dtype(out_dtype).itemsize
    # VMEM footprint: double-buffered x / out tiles + (conservatively 2x) resident weights.
    vmem_bytes = (2 * tb * In_p * cb + 2 * tb * Out_p * ob
                  + 2 * (In_p * L_p + L_p * Out_p) * cb
                  + 2 * (L_p + Out_p) * 4)
    vmem_limit = int(min(64 * 2**20, max(4 * 2**20, 2 * vmem_bytes)))

    cost = pl.CostEstimate(
        flops=2 * B_p * In_p * L_p + 2 * B_p * L_p * Out_p,
        transcendentals=0,
        bytes_accessed=(B_p * In_p * cb + In_p * L_p * cb + L_p * Out_p * cb
                        + (L_p + Out_p) * 4 + B_p * Out_p * ob),
    )

    def _run(single_buffer_weights):
        const_kw = dict(pipeline_mode=pl.Buffered(1)) if single_buffer_weights else {}
        grid_spec = pltpu.PrefetchScalarGridSpec(
            num_scalar_prefetch=0,
            grid=(B_p // tb,),
            in_specs=[
                pl.BlockSpec((tb, In_p), lambda i: (i, 0)),               # x tile (pipelined)
                pl.BlockSpec((In_p, L_p), lambda i: (0, 0), **const_kw),  # SV^T (resident)
                pl.BlockSpec((1, L_p), lambda i: (0, 0), **const_kw),     # b_sv
                pl.BlockSpec((L_p, Out_p), lambda i: (0, 0), **const_kw),  # U^T (resident)
                pl.BlockSpec((1, Out_p), lambda i: (0, 0), **const_kw),   # b_u
            ],
            out_specs=pl.BlockSpec((tb, Out_p), lambda i: (i, 0)),
        )
        return pl.pallas_call(
            _compressed_linear_kernel,
            out_shape=jax.ShapeDtypeStruct((B_p, Out_p), out_dtype),
            grid_spec=grid_spec,
            compiler_params=pltpu.CompilerParams(
                dimension_semantics=("parallel",),
                vmem_limit_bytes=vmem_limit,
            ),
            cost_estimate=cost,
        )(x_p, svt, bsv, ut, bu)

    try:
        out_p = _run(True)
    except Exception:
        # pl.Buffered(1) not supported on this jax/TPU combination: fall back to default
        # (double) buffering of the resident weights; still correct, slightly more VMEM.
        out_p = _run(False)

    return out_p[:B, :Out]


def make_compressed_linear_params(key, out_features, in_features, preserve_ratio):
    """Deterministic parameter construction mirroring CompressedLinear.__init__."""
    k_w, k_bsv, k_bu = jax.random.split(key, 3)

    # Original dense weight (the thing being compressed).
    weights = jax.random.normal(k_w, (out_features, in_features), jnp.float32)

    # Truncated SVD: l = int(preserve_ratio * out_features)
    l = int(preserve_ratio * out_features)
    U, s, Vt = jnp.linalg.svd(weights, full_matrices=False)
    Ul = U[:, :l]                         # (out, l)
    SV = jnp.diag(s[:l]) @ Vt[:l, :]      # (l, in)

    # nn.Linear keeps its default-initialized biases (only .weight is replaced);
    # initialize them deterministically here (uniform like nn.Linear's default).
    bound_sv = 1.0 / jnp.sqrt(in_features)
    bound_u = 1.0 / jnp.sqrt(l)
    b_sv = jax.random.uniform(k_bsv, (l,), jnp.float32, -bound_sv, bound_sv)
    b_u = jax.random.uniform(k_bu, (out_features,), jnp.float32, -bound_u, bound_u)

    return weights, Ul, SV, b_sv, b_u


if __name__ == "__main__":
    key = jax.random.PRNGKey(0)
    k_params, k_x = jax.random.split(key)

    in_features = 96
    out_features = 80
    preserve_ratio = 0.5            # -> rank L = 40 (exercises the 128-padding path)
    batch = 24

    _, Ul, SV, b_sv, b_u = make_compressed_linear_params(
        k_params, out_features, in_features, preserve_ratio
    )
    x = jax.random.normal(k_x, (batch, in_features), jnp.float32)

    # --- fp32 compute path: multi-step batch grid (tb=8 -> 3 steps), tight check.
    y32 = jax.block_until_ready(
        compressed_linear(x, SV, b_sv, Ul, b_u, tb=8, compute_dtype=jnp.float32)
    )
    ref32 = (x @ SV.T + b_sv) @ Ul.T + b_u
    assert y32.shape == (batch, out_features)
    assert jnp.allclose(y32, ref32, atol=2e-3, rtol=1e-3), "fp32 mismatch vs reference"

    # --- bf16 compute path (default, MXU-friendly): check vs a bf16-faithful reference.
    y16 = jax.block_until_ready(compressed_linear(x, SV, b_sv, Ul, b_u))
    xb = x.astype(jnp.bfloat16).astype(jnp.float32)
    svtb = SV.T.astype(jnp.bfloat16).astype(jnp.float32)
    utb = Ul.T.astype(jnp.bfloat16).astype(jnp.float32)
    h_ref = xb @ svtb + b_sv
    ref16 = h_ref.astype(jnp.bfloat16).astype(jnp.float32) @ utb + b_u
    assert y16.shape == (batch, out_features)
    assert jnp.allclose(y16, ref16, atol=1e-2, rtol=1e-2), "bf16 mismatch vs reference"

    print("KERNEL_OK")
</pallas_src>

<mosaic_0001>
module attributes {stable_mosaic.version = 11 : i64} {
  func.func @_compressed_linear_kernel(%arg0: i32, %arg1: memref<8x128xf32, #tpu.memory_space<vmem>>, %arg2: memref<128x128xf32, #tpu.memory_space<vmem>>, %arg3: memref<1x128xf32, #tpu.memory_space<vmem>>, %arg4: memref<128x128xf32, #tpu.memory_space<vmem>>, %arg5: memref<1x128xf32, #tpu.memory_space<vmem>>, %arg6: memref<8x128xf32, #tpu.memory_space<vmem>>) attributes {dimension_semantics = [#tpu.dimension_semantics<parallel>], iteration_bounds = array<i64: 3>, scalar_prefetch = 0 : i64, scratch_operands = 0 : i64, tpu.core_type = #tpu.core_type<tc>, window_params = [{transform_indices = @transform_0, window_bounds = array<i64: 8, 128>}, {pipeline_mode = #tpu.pipeline_mode<synchronous>, transform_indices = @transform_1, window_bounds = array<i64: 128, 128>}, {pipeline_mode = #tpu.pipeline_mode<synchronous>, transform_indices = @transform_2, window_bounds = array<i64: 1, 128>}, {pipeline_mode = #tpu.pipeline_mode<synchronous>, transform_indices = @transform_3, window_bounds = array<i64: 128, 128>}, {pipeline_mode = #tpu.pipeline_mode<synchronous>, transform_indices = @transform_4, window_bounds = array<i64: 1, 128>}, {transform_indices = @transform_5, window_bounds = array<i64: 8, 128>}]} {
    %c0 = arith.constant 0 : index
    %c0_0 = arith.constant 0 : index
    %0 = vector.load %arg1[%c0, %c0_0] : memref<8x128xf32, #tpu.memory_space<vmem>>, vector<8x128xf32>
    %c0_1 = arith.constant 0 : index
    %c0_2 = arith.constant 0 : index
    %1 = vector.load %arg2[%c0_1, %c0_2] : memref<128x128xf32, #tpu.memory_space<vmem>>, vector<128x128xf32>
    %cst = arith.constant dense<0.000000e+00> : vector<8x128xf32>
    %2 = tpu.matmul %0, %1, %cst {dimension_numbers = #tpu.dot_dimension_numbers<[1], [0], [0], [1], [0, 0, 1, 1], [], []>} : vector<8x128xf32>, vector<128x128xf32>, vector<8x128xf32> -> vector<8x128xf32>
    %c0_3 = arith.constant 0 : index
    %c0_4 = arith.constant 0 : index
    %3 = vector.load %arg3[%c0_3, %c0_4] : memref<1x128xf32, #tpu.memory_space<vmem>>, vector<1x128xf32>
    %4 = vector.broadcast %3 : vector<1x128xf32> to vector<8x128xf32>
    %5 = arith.addf %2, %4 : vector<8x128xf32>
    %c0_5 = arith.constant 0 : index
    %c0_6 = arith.constant 0 : index
    %6 = vector.load %arg4[%c0_5, %c0_6] : memref<128x128xf32, #tpu.memory_space<vmem>>, vector<128x128xf32>
    %cst_7 = arith.constant dense<0.000000e+00> : vector<8x128xf32>
    %7 = tpu.matmul %5, %6, %cst_7 {dimension_numbers = #tpu.dot_dimension_numbers<[1], [0], [0], [1], [0, 0, 1, 1], [], []>} : vector<8x128xf32>, vector<128x128xf32>, vector<8x128xf32> -> vector<8x128xf32>
    %c0_8 = arith.constant 0 : index
    %c0_9 = arith.constant 0 : index
    %8 = vector.load %arg5[%c0_8, %c0_9] : memref<1x128xf32, #tpu.memory_space<vmem>>, vector<1x128xf32>
    %9 = vector.broadcast %8 : vector<1x128xf32> to vector<8x128xf32>
    %10 = arith.addf %7, %9 : vector<8x128xf32>
    %c0_10 = arith.constant 0 : index
    %c0_11 = arith.constant 0 : index
    %11 = vector.load %arg6[%c0_10, %c0_11] : memref<8x128xf32, #tpu.memory_space<vmem>>, vector<8x128xf32>
    tpu.vector_store %arg6[%c0_10, %c0_11], %10 {strides = array<i32>} : memref<8x128xf32, #tpu.memory_space<vmem>>, vector<8x128xf32>,
    return
  }
  func.func @transform_0(%arg0: i32) -> (i32, i32) {
    %c0_i32 = arith.constant 0 : i32
    %c0_i32_0 = arith.constant 0 : i32
    return %arg0, %c0_i32 : i32, i32
  }
  func.func @transform_1(%arg0: i32) -> (i32, i32) {
    %c0_i32 = arith.constant 0 : i32
    %c0_i32_0 = arith.constant 0 : i32
    %c0_i32_1 = arith.constant 0 : i32
    return %c0_i32, %c0_i32_0 : i32, i32
  }
  func.func @transform_2(%arg0: i32) -> (i32, i32) {
    %c0_i32 = arith.constant 0 : i32
    %c0_i32_0 = arith.constant 0 : i32
    %c0_i32_1 = arith.constant 0 : i32
    return %c0_i32, %c0_i32_0 : i32, i32
  }
  func.func @transform_3(%arg0: i32) -> (i32, i32) {
    %c0_i32 = arith.constant 0 : i32
    %c0_i32_0 = arith.constant 0 : i32
    %c0_i32_1 = arith.constant 0 : i32
    return %c0_i32, %c0_i32_0 : i32, i32
  }
  func.func @transform_4(%arg0: i32) -> (i32, i32) {
    %c0_i32 = arith.constant 0 : i32
    %c0_i32_0 = arith.constant 0 : i32
    %c0_i32_1 = arith.constant 0 : i32
    return %c0_i32, %c0_i32_0 : i32, i32
  }
  func.func @transform_5(%arg0: i32) -> (i32, i32) {
    %c0_i32 = arith.constant 0 : i32
    %c0_i32_0 = arith.constant 0 : i32
    return %arg0, %c0_i32 : i32, i32
  }
}

module attributes {stable_mosaic.version = 11 : i64} {
  func.func @_compressed_linear_kernel(%arg0: i32, %arg1: memref<8x128xf32, #tpu.memory_space<vmem>>, %arg2: memref<128x128xf32, #tpu.memory_space<vmem>>, %arg3: memref<1x128xf32, #tpu.memory_space<vmem>>, %arg4: memref<128x128xf32, #tpu.memory_space<vmem>>, %arg5: memref<1x128xf32, #tpu.memory_space<vmem>>, %arg6: memref<8x128xf32, #tpu.memory_space<vmem>>) attributes {dimension_semantics = [#tpu.dimension_semantics<parallel>], iteration_bounds = array<i64: 3>, scalar_prefetch = 0 : i64, scratch_operands = 0 : i64, tpu.core_type = #tpu.core_type<tc>, window_params = [{transform_indices = @transform_0, window_bounds = array<i64: 8, 128>}, {pipeline_mode = #tpu.pipeline_mode<synchronous>, transform_indices = @transform_1, window_bounds = array<i64: 128, 128>}, {pipeline_mode = #tpu.pipeline_mode<synchronous>, transform_indices = @transform_2, window_bounds = array<i64: 1, 128>}, {pipeline_mode = #tpu.pipeline_mode<synchronous>, transform_indices = @transform_3, window_bounds = array<i64: 128, 128>}, {pipeline_mode = #tpu.pipeline_mode<synchronous>, transform_indices = @transform_4, window_bounds = array<i64: 1, 128>}, {transform_indices = @transform_5, window_bounds = array<i64: 8, 128>}]} {
    %c0 = arith.constant 0 : index
    %c0_0 = arith.constant 0 : index
    %0 = vector.load %arg1[%c0, %c0_0] : memref<8x128xf32, #tpu.memory_space<vmem>>, vector<8x128xf32>
    %c0_1 = arith.constant 0 : index
    %c0_2 = arith.constant 0 : index
    %1 = vector.load %arg2[%c0_1, %c0_2] : memref<128x128xf32, #tpu.memory_space<vmem>>, vector<128x128xf32>
    %cst = arith.constant dense<0.000000e+00> : vector<8x128xf32>
    %2 = tpu.matmul %0, %1, %cst {dimension_numbers = #tpu.dot_dimension_numbers<[1], [0], [0], [1], [0, 0, 1, 1], [], []>} : vector<8x128xf32>, vector<128x128xf32>, vector<8x128xf32> -> vector<8x128xf32>
    %c0_3 = arith.constant 0 : index
    %c0_4 = arith.constant 0 : index
    %3 = vector.load %arg3[%c0_3, %c0_4] : memref<1x128xf32, #tpu.memory_space<vmem>>, vector<1x128xf32>
    %4 = vector.broadcast %3 : vector<1x128xf32> to vector<8x128xf32>
    %5 = arith.addf %2, %4 : vector<8x128xf32>
    %c0_5 = arith.constant 0 : index
    %c0_6 = arith.constant 0 : index
    %6 = vector.load %arg4[%c0_5, %c0_6] : memref<128x128xf32, #tpu.memory_space<vmem>>, vector<128x128xf32>
    %cst_7 = arith.constant dense<0.000000e+00> : vector<8x128xf32>
    %7 = tpu.matmul %5, %6, %cst_7 {dimension_numbers = #tpu.dot_dimension_numbers<[1], [0], [0], [1], [0, 0, 1, 1], [], []>} : vector<8x128xf32>, vector<128x128xf32>, vector<8x128xf32> -> vector<8x128xf32>
    %c0_8 = arith.constant 0 : index
    %c0_9 = arith.constant 0 : index
    %8 = vector.load %arg5[%c0_8, %c0_9] : memref<1x128xf32, #tpu.memory_space<vmem>>, vector<1x128xf32>
    %9 = vector.broadcast %8 : vector<1x128xf32> to vector<8x128xf32>
    %10 = arith.addf %7, %9 : vector<8x128xf32>
    %c0_10 = arith.constant 0 : index
    %c0_11 = arith.constant 0 : index
    %11 = vector.load %arg6[%c0_10, %c0_11] : memref<8x128xf32, #tpu.memory_space<vmem>>, vector<8x128xf32>
    tpu.vector_store %arg6[%c0_10, %c0_11], %10 {strides = array<i32>} : memref<8x128xf32, #tpu.memory_space<vmem>>, vector<8x128xf32>,
    return
  }
  func.func @transform_0(%arg0: i32) -> (i32, i32) {
    %c0_i32 = arith.constant 0 : i32
    %c0_i32_0 = arith.constant 0 : i32
    return %arg0, %c0_i32 : i32, i32
  }
  func.func @transform_1(%arg0: i32) -> (i32, i32) {
    %c0_i32 = arith.constant 0 : i32
    %c0_i32_0 = arith.constant 0 : i32
    %c0_i32_1 = arith.constant 0 : i32
    return %c0_i32, %c0_i32_0 : i32, i32
  }
  func.func @transform_2(%arg0: i32) -> (i32, i32) {
    %c0_i32 = arith.constant 0 : i32
    %c0_i32_0 = arith.constant 0 : i32
    %c0_i32_1 = arith.constant 0 : i32
    return %c0_i32, %c0_i32_0 : i32, i32
  }
  func.func @transform_3(%arg0: i32) -> (i32, i32) {
    %c0_i32 = arith.constant 0 : i32
    %c0_i32_0 = arith.constant 0 : i32
    %c0_i32_1 = arith.constant 0 : i32
    return %c0_i32, %c0_i32_0 : i32, i32
  }
  func.func @transform_4(%arg0: i32) -> (i32, i32) {
    %c0_i32 = arith.constant 0 : i32
    %c0_i32_0 = arith.constant 0 : i32
    %c0_i32_1 = arith.constant 0 : i32
    return %c0_i32, %c0_i32_0 : i32, i32
  }
  func.func @transform_5(%arg0: i32) -> (i32, i32) {
    %c0_i32 = arith.constant 0 : i32
    %c0_i32_0 = arith.constant 0 : i32
    return %arg0, %c0_i32 : i32, i32
  }
}

</mosaic_0001>

<bundles_post_ra>
// kernel: tpu_custom_call.1
= control target key start
LH: loop header
LB: loop body
LE: loop exit
PB: predicated region body
PF: predicated region fallthrough
CT: control target
= control target key end

     0   :  { %10 = vsyncpa [#allocation3], 0  ;;  %s1248_s0 = inlined_call_operand.hbm [shape: f32[24,128], index: 0, kind: input, shape index: {}]   ;;  %s1249_s1 = inlined_call_operand.hbm [shape: f32[128,128], index: 1, kind: input, shape index: {}]   ;;  %s1250_s2 = inlined_call_operand.vmem [shape: f32[1,128], index: 2, kind: input, shape index: {}]   ;;  %s1251_s3 = inlined_call_operand.hbm [shape: f32[128,128], index: 3, kind: input, shape index: {}]   ;;  %s1252_s4 = inlined_call_operand.vmem [shape: f32[1,128], index: 4, kind: input, shape index: {}]   ;;  %s1253_s5 = inlined_call_operand.hbm [shape: f32[24,128], index: 5, kind: output, shape index: {}]  }
   0x1   :  { %12 = vsyncpa [#allocation3 + $0x1], 0 }
   0x2   :  { %13 = vsyncpa [#allocation6], 0 }
   0x3   :  { %14 = vsyncpa [#allocation4], 0 }
   0x4   :  { %16 = vsyncpa [#allocation4 + $0x1], 0  ;;  %s999_s18 = smov 0   ;;  %s1001_s19 = smov 0  }
   0x5   :  { %s1003_s20 = smov 0   ;;  %s1005_s21 = smov 0  }
   0x6 LB: > { %s1020_s22 = sadd.s32 4294967295, %s958_s21   ;;  %s560_s23 = sadd.s32 4294967294, %s958_s21   ;;  %s958_s21 = sphi %s1005_s21, %s1272_s21   ;;  %s954_s20 = sphi %s1003_s20, %s1271_s20   ;;  %s950_s19 = sphi %s1001_s19, %s1270_s19   ;;  %s946_s18 = sphi %s999_s18, %s1269_s18  }
   0x7   : > { %p42_p0 = scmp.ne.s32.totalorder %s950_s19, %s946_s18  ;;  %p1254_p1 = scmp.eq.s32.totalorder %s1020_s22, 0 }
   0x8   : > { %p156_p3 = scmp.eq.s32.totalorder %s560_s23, 2  ;;  %p561_p5 = scmp.ge.s32.totalorder %s958_s21, 1 }
   0x9   : > { %p1029_p4 = por %p1254_p1, %p42_p0  ;;  %p163_p7 = scmp.lt.s32.totalorder %s958_s21, 4 }
   0xa   : > { %p1034_p6 = por %p156_p3, %p42_p0  ;;  %s960_s27 = smov [#allocation5]  }
   0xb   : > { %s1257_s24 = scalar_select %p1029_p4, 1, 0 }
   0xc   : > { %s1258_s25 = scalar_select %p1034_p6, 1, 0 }
   0xd   : > { %p1039_p8 = pnand %p561_p5, %p163_p7  ;;  %s175_s28 = sshll.u32 %s960_s27, 4  ;;  %s176_s28 = int_to_ptr.vmem [resolvable:$true] %s175_s28 }
   0xe   : > { %s961_s30 = smov [#allocation7]   ;;  %s802_s9 = scalar_lea.hbm %s1249_s1, 2048 }
   0xf   : > { %s1259_s26 = scalar_select %p1039_p8, 1, 0 }
  0x10   : > { %p742_p9 = pneg %p1039_p8  ;;  %s191_s6 = sshll.u32 %s961_s30, 4  ;;  %s1051_s6 = int_to_ptr.vmem [resolvable:$true] %s191_s6 }
  0x11   : > { %p803_p11 = scmp.ne.s32.totalorder %s1249_s1, %s802_s9  ;;  %p809_p3 = scmp.lt.u32.totalorder %s802_s9, %s1249_s1 }
  0x12   : > { %p1047_p10 = pnand %p742_p9, %p1254_p1 }
  0x14   : > { %p804_p12 = pneg %p1047_p10 }
  0x16   : > { %p805_p13 = pnand %p804_p12, %p803_p11 }
  0x18   : > { %p806_p0 = pneg %p805_p13 }
  0x1a   : > { %p811_p5 = pnand %p809_p3, %p806_p0 }
  0x1c   : > { %814 = shalt.err (!%p811_p5)
}
  0x1d   : > { %s815_s14 = scalar_lea.vmem %s176_s28, 2048  ;;  %p823_p2 = scmp.lt.s32.totalorder %s176_s28, %s176_s28 }
  0x1e   : > { %p816_p7 = scmp.ne.s32.totalorder %s176_s28, %s815_s14  ;;  %p824_p6 = scmp.lt.s32.totalorder %s815_s14, %s815_s14 }
  0x20   : > { %p818_p9 = pnand %p816_p7, %p804_p12  ;;  %p825_p4 = por %p824_p6, %p823_p2 }
  0x22   : > { %p819_p1 = pneg %p818_p9 }
  0x24   : > { %p826_p8 = pnand %p825_p4, %p819_p1 }
  0x26   : > { %829 = shalt.err (!%p826_p8)
}
  0x27   : > { %s962_s15 = smov 128   ;;  %s963_s16 = smov 8  }
  0x28   : > { %745 = dma.hbm_to_vmem [thread:$0]  (!%p1047_p10), %s1249_s1, 2048, %s176_s28, [#allocation6], %s962_s15, %s962_s15, %s963_s16  }
  0x29   : > { %s830_s7 = scalar_lea.hbm %s1251_s3, 2048 }
  0x2a   : > { %p831_p11 = scmp.ne.s32.totalorder %s1251_s3, %s830_s7  ;;  %p837_p4 = scmp.lt.u32.totalorder %s830_s7, %s1251_s3 }
  0x2c   : > { %p833_p1 = pnand %p831_p11, %p804_p12 }
  0x2e   : > { %p834_p2 = pneg %p833_p1 }
  0x30   : > { %p839_p6 = pnand %p837_p4, %p834_p2 }
  0x32   : > { %842 = shalt.err (!%p839_p6)
}
  0x33   : > { %s843_s28 = scalar_lea.vmem %s1051_s6, 2048  ;;  %p851_p3 = scmp.lt.s32.totalorder %s1051_s6, %s1051_s6 }
  0x34   : > { %p844_p8 = scmp.ne.s32.totalorder %s1051_s6, %s843_s28  ;;  %p852_p5 = scmp.lt.s32.totalorder %s843_s28, %s843_s28 }
  0x36   : > { %p846_p13 = pnand %p844_p8, %p804_p12  ;;  %p853_p7 = por %p852_p5, %p851_p3 }
  0x38   : > { %p847_p0 = pneg %p846_p13 }
  0x3a   : > { %p854_p9 = pnand %p853_p7, %p847_p0 }
  0x3c   : > { %857 = shalt.err (!%p854_p9)
}
  0x3d   : > { %748 = dma.hbm_to_vmem [thread:$0]  (!%p1047_p10), %s1251_s3, 2048, %s1051_s6, [#allocation6], %s962_s15, %s962_s15, %s963_s16  }
  0x3e   : > { %s1101_s14 = sadd.s32 1, %s958_s21   ;;  %s29_s29 = sadd.s32 1, %s954_s20 }
  0x3f   : > { %s26_s17 = ssub.s32 %s958_s21, %s1101_s14  ;;  %p36_p12 = scmp.ne.s32.totalorder %s954_s20, %s950_s19 }
  0x40   : > { %p27_p11 = scmp.eq.s32.totalorder %s26_s17, 0  ;;  %p37_p1 = scmp.eq.s32.totalorder %s958_s21, 0 }
  0x41   : > { %p1261_p2 = scmp.eq.s32.totalorder %s1020_s22, 2  ;;  %p759_p6 = scmp.lt.s32.totalorder %s958_s21, 3 }
  0x42   : > { %s1117_s27 = scalar_select %p27_p11, %s954_s20, %s29_s29  }
  0x43   : > { %p1111_p4 = por %p1261_p2, %p36_p12  ;;  %p38_p8 = por %p37_p1, %p36_p12 }
  0x44   : > { %s208_s30 = sand.u32 1, %s954_s20   ;;  %s566_s6 = sshll.u32 %s958_s21, 7 }
  0x45   : > { %s565_s7 = sshll.u32 %s208_s30, 3  ;;  %s1124_s8 = scalar_lea.hbm %s1248_s0, %s566_s6 }
  0x46   : > { %s212_s9 = scalar_lea.vmem [#allocation2], %s565_s7  ;;  %p1128_p10 = pnand %p759_p6, %p38_p8 }
  0x47   : > { %s219_s10 = sshll.u32 %s212_s9, 4  ;;  %s209_s28 = scalar_lea.sflag [#allocation3], %s208_s30  ;;  %s1126_s10 = int_to_ptr.vmem [resolvable:$true] %s219_s10 }
  0x48   : > { %s858_s12 = scalar_lea.hbm %s1124_s8, 128  ;;  %p860_p0 = pneg %p1128_p10 }
  0x49   : > { %p859_p13 = scmp.ne.s32.totalorder %s1124_s8, %s858_s12  ;;  %s863_s17 = scalar_lea.hbm %s1248_s0, 384 }
  0x4a   : > { %p864_p7 = scmp.lt.u32.totalorder %s1124_s8, %s1248_s0  ;;  %p865_p9 = scmp.lt.u32.totalorder %s863_s17, %s858_s12 }
  0x4b   : > { %p861_p3 = pnand %p860_p0, %p859_p13  ;;  %p867_p11 = scmp.lt.u32.totalorder %s858_s12, %s1124_s8 }
  0x4c   : > { %p866_p12 = por %p865_p9, %p864_p7 }
  0x4d   : > { %p862_p5 = pneg %p861_p3 }
  0x4e   : > { %p868_p1 = por %p867_p11, %p866_p12 }
  0x50   : > { %p869_p2 = pnand %p868_p1, %p862_p5 }
  0x52   : > { %872 = shalt.err (!%p869_p2)
}
  0x53   : > { %s873_s30 = scalar_lea.vmem %s1126_s10, 128  ;;  %s964_s15 = smov [#allocation2]  }
  0x54   : > { %p874_p6 = scmp.ne.s32.totalorder %s1126_s10, %s873_s30  ;;  %s878_s16 = sshll.u32 %s964_s15, 4  ;;  %s879_s16 = int_to_ptr.vmem [resolvable:$false] %s878_s16 }
  0x55   : > { %s880_s9 = scalar_lea.vmem %s879_s16, 256  ;;  %p881_p3 = scmp.lt.s32.totalorder %s1126_s10, %s879_s16 }
  0x56   : > { %p876_p8 = pnand %p874_p6, %p860_p0  ;;  %p882_p7 = scmp.lt.s32.totalorder %s880_s9, %s873_s30 }
  0x58   : > { %p877_p13 = pneg %p876_p8  ;;  %p883_p9 = por %p882_p7, %p881_p3 }
  0x5a   : > { %p884_p12 = pnand %p883_p9, %p877_p13 }
  0x5c   : > { %887 = shalt.err (!%p884_p12)
}
  0x5d   : > { %752 = dma.hbm_to_vmem [thread:$0]  (!%p1128_p10), %s1124_s8, 128, %s1126_s10, %s209_s28  }
  0x5e   : > { %p1264_p5 = scmp.ne.s32.totalorder %s1259_s26, 0 }
  0x5f   : > { %s1160_s12 = sand.u32 (!%p1264_p5), 1, %s950_s19   ;;  %p1265_p0 = scmp.ne.s32.totalorder (!%p1264_p5), %s1257_s24, 0 }
  0x60   : > { %228 = sbr.rel (%p1264_p5) target bundleno = 583 (0x247), region = 40  ;;  %s568_s13 = sshll.u32 (!%p1264_p5), %s1160_s12, 3 }
  0x61   : > { %s231_s29 = scalar_lea.sflag (!%p1264_p5), [#allocation3], %s1160_s12  ;;  %s1166_s17 = scalar_lea.vmem (!%p1264_p5), [#allocation2], %s568_s13 }
  0x67   : > { %933 = dma.done.wait (%p1265_p0), %s231_s29, 128  }
  0x68   : > { %935 = vsyncadd (%p1265_p0), %s231_s29, 4294967168  ;;  %p1266_p10 = scmp.eq.s32.totalorder %s1020_s22, 0 }
  0x6a   : > { %937 = dma.done.wait (%p1266_p10), [#allocation6], 4096   ;;  %p1267_p11 = pmov %p1266_p10 }
  0x6b   : > { %v965_v0 = vmov 0.0|0.0   ;;  %vm966_vm0 = vmmov 0   ;;  %v967_v1 = vmov 0.0   ;;  %v270_v2 = vld [vmem:[#allocation5] sm:$0xff]  ;;  %v271_v3 = vld [vmem:[#allocation5 + $0x8] sm:$0xff]  ;;  %v272_v4 = vld [vmem:[#allocation5 + $0x10] sm:$0xff] }
  0x6c   : > { %939 = vsyncadd (%p1267_p11), [#allocation6], 4294963200  ;;  %682 = vmatprep.subr.bf16.mxu0 %v965_v0  ;;  %644 = vmatprep.mubr.msk.f32.mxu0 %vm966_vm0, %v967_v1  ;;  %v683_v5 = vpack.c.bf16 %v271_v3, %v270_v2  ;;  %v273_v6 = vld [vmem:[#allocation5 + $0x18] sm:$0xff]  ;;  %v274_v8 = vld [vmem:[#allocation5 + $0x20] sm:$0xff]  ;;  %s575_s11 = sshll.u32 %s1020_s22, 7  ;;  %s268_s28 = scalar_lea.vmem [#allocation8], %s568_s13 }
  0x6d   : > { %706 = vmatprep.subr.bf16.mxu1 %v965_v0  ;;  %679 = vmatprep.mubr.msk.f32.mxu1 %vm966_vm0, %v967_v1  ;;  %v686_v7 = vpack.c.bf16 %v273_v6, %v272_v4  ;;  %v275_v9 = vld [vmem:[#allocation5 + $0x28] sm:$0xff]  ;;  %v363_v10 = vld [vmem:[#allocation7] sm:$0xff]  ;;  %v365_v12 = vld [vmem:[#allocation7 + $0x10] sm:$0xff]  ;;  %s471_s7 = sshll.u32 %s268_s28, 4  ;;  %s1205_s15 = scalar_lea.hbm %s1253_s5, %s575_s11  ;;  %s1207_s7 = int_to_ptr.vmem [resolvable:$true] %s471_s7 }
  0x6e   : > { %684 = vmatpush3.bf16.msra.mxu0 %v683_v5  ;;  %v364_v11 = vld [vmem:[#allocation7 + $0x8] sm:$0xff]  ;;  %v366_v13 = vld [vmem:[#allocation7 + $0x18] sm:$0xff]  ;;  %v689_v14 = vpack.c.bf16 %v275_v9, %v274_v8  ;;  %v276_v16 = vld [vmem:[#allocation5 + $0x30] sm:$0xff]  ;;  %s458_s16 = scalar_lea.sflag [#allocation4], %s1160_s12  ;;  %s888_s9 = scalar_lea.vmem %s1207_s7, 128 }
  0x6f   : > { %685 = vmatprep.subr.bf16.mxu0 %v965_v0  ;;  %v707_v15 = vpack.c.bf16 %v364_v11, %v363_v10  ;;  %v277_v17 = vld [vmem:[#allocation5 + $0x38] sm:$0xff]  ;;  %v710_v18 = vpack.c.bf16 %v366_v13, %v365_v12  ;;  %v367_v19 = vld [vmem:[#allocation7 + $0x20] sm:$0xff]  ;;  %v368_v20 = vld [vmem:[#allocation7 + $0x28] sm:$0xff]  ;;  %p889_p1 = scmp.ne.s32.totalorder %s1207_s7, %s888_s9  ;;  %s968_s22 = smov [#allocation8]  }
  0x70   : > { %v692_v21 = vpack.c.bf16 %v277_v17, %v276_v16  ;;  %v278_v22 = vld [vmem:[#allocation5 + $0x40] sm:$0xff]  ;;  %v279_v23 = vld [vmem:[#allocation5 + $0x48] sm:$0xff]  ;;  %v713_v24 = vpack.c.bf16 %v368_v20, %v367_v19  ;;  %v369_v25 = vld [vmem:[#allocation7 + $0x30] sm:$0xff]  ;;  %s892_s13 = sshll.u32 %s968_s22, 4  ;;  %s893_s13 = int_to_ptr.vmem [resolvable:$false] %s892_s13 }
  0x71   : > { %708 = vmatpush3.bf16.msra.mxu1 %v707_v15  ;;  %v370_v26 = vld [vmem:[#allocation7 + $0x38] sm:$0xff]  ;;  %v695_v27 = vpack.c.bf16 %v279_v23, %v278_v22  ;;  %v280_v28 = vld [vmem:[#allocation5 + $0x50] sm:$0xff]  ;;  %v371_v31 = vld [vmem:[#allocation7 + $0x40] sm:$0xff]  ;;  %p890_p2 = pnand %p889_p1, %p1111_p4  ;;  %s894_s29 = scalar_lea.vmem %s893_s13, 256 }
  0x72   : > { %687 = vmatpush3.bf16.msra.mxu0 %v686_v7  ;;  %709 = vmatprep.subr.bf16.mxu1 %v965_v0  ;;  %v281_v29 = vld [vmem:[#allocation5 + $0x58] sm:$0xff]  ;;  %v716_v30 = vpack.c.bf16 %v370_v26, %v369_v25  ;;  %v372_v32 = vld [vmem:[#allocation7 + $0x48] sm:$0xff]  ;;  %v282_v34 = vld [vmem:[#allocation5 + $0x60] sm:$0xff]  ;;  %p895_p8 = scmp.lt.s32.totalorder %s1207_s7, %s893_s13  ;;  %p896_p13 = scmp.lt.s32.totalorder %s894_s29, %s888_s9 }
  0x73   : > { %688 = vmatprep.subr.bf16.mxu0 %v965_v0  ;;  %v698_v33 = vpack.c.bf16 %v281_v29, %v280_v28  ;;  %v283_v35 = vld [vmem:[#allocation5 + $0x68] sm:$0xff]  ;;  %v719_v36 = vpack.c.bf16 %v372_v32, %v371_v31  ;;  %v373_v37 = vld [vmem:[#allocation7 + $0x50] sm:$0xff]  ;;  %v374_v38 = vld [vmem:[#allocation7 + $0x58] sm:$0xff]  ;;  %p891_p6 = pneg %p890_p2 }
  0x74   : > { %v701_v39 = vpack.c.bf16 %v283_v35, %v282_v34  ;;  %v284_v40 = vld [vmem:[#allocation5 + $0x70] sm:$0xff]  ;;  %v285_v41 = vld [vmem:[#allocation5 + $0x78] sm:$0xff]  ;;  %v722_v42 = vpack.c.bf16 %v374_v38, %v373_v37  ;;  %v375_v43 = vld [vmem:[#allocation7 + $0x60] sm:$0xff]  ;;  %p897_p3 = por %p896_p13, %p895_p8 }
  0x75   : > { %711 = vmatpush3.bf16.msra.mxu1 %v710_v18  ;;  %v376_v44 = vld [vmem:[#allocation7 + $0x68] sm:$0xff]  ;;  %v704_v45 = vpack.c.bf16 %v285_v41, %v284_v40  ;;  %v269_v47 = vld [vmem:[%s1166_s17] sm:$0xff] }
  0x76   : > { %690 = vmatpush3.bf16.msra.mxu0 %v689_v14  ;;  %712 = vmatprep.subr.bf16.mxu1 %v965_v0  ;;  %v725_v46 = vpack.c.bf16 %v376_v44, %v375_v43  ;;  %v377_v48 = vld [vmem:[#allocation7 + $0x70] sm:$0xff]  ;;  %v378_v49 = vld [vmem:[#allocation7 + $0x78] sm:$0xff]  ;;  %p898_p7 = pnand %p897_p3, %p891_p6 }
  0x77   : > { %691 = vmatprep.subr.bf16.mxu0 %v965_v0  ;;  %v728_v50 = vpack.c.bf16 %v378_v49, %v377_v48  ;;  %v572_v51 = vld [vmem:[%s1250_s2] ss:$0 sm:$0xff] }
  0x78   : > { %v573_v55 = vld [vmem:[%s1252_s4] ss:$0 sm:$0xff] }
  0x79   : > { %714 = vmatpush3.bf16.msra.mxu1 %v713_v24 }
  0x7a   : > { %693 = vmatpush3.bf16.msra.mxu0 %v692_v21  ;;  %715 = vmatprep.subr.bf16.mxu1 %v965_v0 }
  0x7b   : > { %694 = vmatprep.subr.bf16.mxu0 %v965_v0 }
  0x7d   : > { %717 = vmatpush3.bf16.msra.mxu1 %v716_v30 }
  0x7e   : > { %696 = vmatpush3.bf16.msra.mxu0 %v695_v27  ;;  %718 = vmatprep.subr.bf16.mxu1 %v965_v0 }
  0x7f   : > { %697 = vmatprep.subr.bf16.mxu0 %v965_v0 }
  0x81   : > { %720 = vmatpush3.bf16.msra.mxu1 %v719_v36 }
  0x82   : > { %699 = vmatpush3.bf16.msra.mxu0 %v698_v33  ;;  %721 = vmatprep.subr.bf16.mxu1 %v965_v0 }
  0x83   : > { %700 = vmatprep.subr.bf16.mxu0 %v965_v0 }
  0x85   : > { %723 = vmatpush3.bf16.msra.mxu1 %v722_v42 }
  0x86   : > { %702 = vmatpush3.bf16.msra.mxu0 %v701_v39  ;;  %724 = vmatprep.subr.bf16.mxu1 %v965_v0 }
  0x87   : > { %703 = vmatprep.subr.bf16.mxu0 %v965_v0 }
  0x89   : > { %726 = vmatpush3.bf16.msra.mxu1 %v725_v46 }
  0x8a   : > { %705 = vmatpush3.bf16.msra.mxu0 %v704_v45  ;;  %727 = vmatprep.subr.bf16.mxu1 %v965_v0 }
  0x8d   : > { %645 = vmatmul.mubr.f32.vlgmr.msra.gmra.mrb[0].mxu0 %v269_v47  ;;  %729 = vmatpush3.bf16.msra.mxu1 %v728_v50 }
 0x160   : > { %v359_v52 = vpop.f32.mrb[0].mxu0 }
 0x161   : > { %v360_v53 = vadd.f32 %v572_v51, %v359_v52  ;;  %v646_v54 = vpop.f32.mrb[1].mxu0 }
 0x163   : > { %680 = vmatmul.mubr.f32.vlgmr.msra.gmra.mrb[0].mxu1 %v360_v53 }
 0x236   : > { %v452_v56 = vpop.f32.mrb[0].mxu1 }
 0x237   : > { %v453_v57 = vadd.f32 %v573_v55, %v452_v56  ;;  %v681_v58 = vpop.f32.mrb[1].mxu1 }
 0x239   : > { %456 = vst [vmem:[%s268_s28] sm:$0xff] %v453_v57 }
 0x23a   : > { %901 = shalt.err (!%p898_p7)
}
 0x23b   : > { %s902_s12 = scalar_lea.hbm %s1205_s15, 128  ;;  %s906_s26 = scalar_lea.hbm %s1253_s5, 384 }
 0x23c   : > { %p903_p9 = scmp.ne.s32.totalorder %s1205_s15, %s902_s12  ;;  %p907_p0 = scmp.lt.u32.totalorder %s1205_s15, %s1253_s5 }
 0x23d   : > { %p908_p10 = scmp.lt.u32.totalorder %s906_s26, %s902_s12  ;;  %p910_p1 = scmp.lt.u32.totalorder %s902_s12, %s1205_s15 }
 0x23e   : > { %p904_p12 = pnand %p903_p9, %p1111_p4 }
 0x23f   : > { %p909_p11 = por %p908_p10, %p907_p0 }
 0x240   : > { %p905_p5 = pneg %p904_p12 }
 0x241   : > { %p911_p2 = por %p910_p1, %p909_p11 }
 0x243   : > { %p912_p6 = pnand %p911_p2, %p905_p5 }
 0x245   : > { %915 = shalt.err (!%p912_p6)
}
 0x246   : > { %740 = dma.vmem_to_hbm [thread:$0]  (%p1111_p4), %s1207_s7, 128, %s1205_s15, %s458_s16  }
 0x247 PF: > { %p762_p8 = scmp.ge.s32.totalorder %s958_s21, 2  ;;  %s483_s11 = sand.u32 1, %s946_s18  }
 0x248   : > { %p1268_p13 = scmp.ne.s32.totalorder %s1258_s25, 0  ;;  %s484_s28 = scalar_lea.sflag [#allocation4], %s483_s11 }
 0x24a   : > { %p754_p3 = pnand %p762_p8, %p1268_p13 }
 0x24c   : > { %941 = dma.done.wait (!%p754_p3), %s484_s28, 128  }
 0x24d   : > { %943 = vsyncadd (!%p754_p3), %s484_s28, 4294967168  ;;  %p19_p7 = scmp.ge.s32.totalorder %s1101_s14, 5   ;;  %s1269_s18 = smov %s950_s19 }
 0x24e   : > { %s1270_s19 = smov %s954_s20  ;;  %s1271_s20 = smov %s1117_s27 }
 0x24f   : > { %s1272_s21 = smov %s1101_s14  ;;  %21 = sbr.rel (!%p19_p7) target bundleno = 6 (0x6), region = 93 }
 0x256   :  { %489 = vsyncpa [#allocation3], 1 }
 0x257   :  { %491 = vsyncpa [#allocation3 + $0x1], 1 }
 0x258   :  { %492 = vsyncpa [#allocation6], 1 }
 0x259   :  { %493 = vsyncpa [#allocation4], 1 }
 0x25a   :  { %495 = vsyncpa [#allocation4 + $0x1], 1 }

// kernel: tpu_custom_call.1
= control target key start
LH: loop header
LB: loop body
LE: loop exit
PB: predicated region body
PF: predicated region fallthrough
CT: control target
= control target key end

     0   :  { %10 = vsyncpa [#allocation3], 0  ;;  %s1248_s0 = inlined_call_operand.hbm [shape: f32[24,128], index: 0, kind: input, shape index: {}]   ;;  %s1249_s1 = inlined_call_operand.hbm [shape: f32[128,128], index: 1, kind: input, shape index: {}]   ;;  %s1250_s2 = inlined_call_operand.vmem [shape: f32[1,128], index: 2, kind: input, shape index: {}]   ;;  %s1251_s3 = inlined_call_operand.hbm [shape: f32[128,128], index: 3, kind: input, shape index: {}]   ;;  %s1252_s4 = inlined_call_operand.vmem [shape: f32[1,128], index: 4, kind: input, shape index: {}]   ;;  %s1253_s5 = inlined_call_operand.hbm [shape: f32[24,128], index: 5, kind: output, shape index: {}]  }
   0x1   :  { %12 = vsyncpa [#allocation3 + $0x1], 0 }
   0x2   :  { %13 = vsyncpa [#allocation6], 0 }
   0x3   :  { %14 = vsyncpa [#allocation4], 0 }
   0x4   :  { %16 = vsyncpa [#allocation4 + $0x1], 0  ;;  %s999_s18 = smov 0   ;;  %s1001_s19 = smov 0  }
   0x5   :  { %s1003_s20 = smov 0   ;;  %s1005_s21 = smov 0  }
   0x6 LB: > { %s1020_s22 = sadd.s32 4294967295, %s958_s21   ;;  %s560_s23 = sadd.s32 4294967294, %s958_s21   ;;  %s958_s21 = sphi %s1005_s21, %s1272_s21   ;;  %s954_s20 = sphi %s1003_s20, %s1271_s20   ;;  %s950_s19 = sphi %s1001_s19, %s1270_s19   ;;  %s946_s18 = sphi %s999_s18, %s1269_s18  }
   0x7   : > { %p42_p0 = scmp.ne.s32.totalorder %s950_s19, %s946_s18  ;;  %p1254_p1 = scmp.eq.s32.totalorder %s1020_s22, 0 }
   0x8   : > { %p156_p3 = scmp.eq.s32.totalorder %s560_s23, 2  ;;  %p561_p5 = scmp.ge.s32.totalorder %s958_s21, 1 }
   0x9   : > { %p1029_p4 = por %p1254_p1, %p42_p0  ;;  %p163_p7 = scmp.lt.s32.totalorder %s958_s21, 4 }
   0xa   : > { %p1034_p6 = por %p156_p3, %p42_p0  ;;  %s960_s27 = smov [#allocation5]  }
   0xb   : > { %s1257_s24 = scalar_select %p1029_p4, 1, 0 }
   0xc   : > { %s1258_s25 = scalar_select %p1034_p6, 1, 0 }
   0xd   : > { %p1039_p8 = pnand %p561_p5, %p163_p7  ;;  %s175_s28 = sshll.u32 %s960_s27, 4  ;;  %s176_s28 = int_to_ptr.vmem [resolvable:$true] %s175_s28 }
   0xe   : > { %s961_s30 = smov [#allocation7]   ;;  %s802_s9 = scalar_lea.hbm %s1249_s1, 2048 }
   0xf   : > { %s1259_s26 = scalar_select %p1039_p8, 1, 0 }
  0x10   : > { %p742_p9 = pneg %p1039_p8  ;;  %s191_s6 = sshll.u32 %s961_s30, 4  ;;  %s1051_s6 = int_to_ptr.vmem [resolvable:$true] %s191_s6 }
  0x11   : > { %p803_p11 = scmp.ne.s32.totalorder %s1249_s1, %s802_s9  ;;  %p809_p3 = scmp.lt.u32.totalorder %s802_s9, %s1249_s1 }
  0x12   : > { %p1047_p10 = pnand %p742_p9, %p1254_p1 }
  0x14   : > { %p804_p12 = pneg %p1047_p10 }
  0x16   : > { %p805_p13 = pnand %p804_p12, %p803_p11 }
  0x18   : > { %p806_p0 = pneg %p805_p13 }
  0x1a   : > { %p811_p5 = pnand %p809_p3, %p806_p0 }
  0x1c   : > { %814 = shalt.err (!%p811_p5)
}
  0x1d   : > { %s815_s14 = scalar_lea.vmem %s176_s28, 2048  ;;  %p823_p2 = scmp.lt.s32.totalorder %s176_s28, %s176_s28 }
  0x1e   : > { %p816_p7 = scmp.ne.s32.totalorder %s176_s28, %s815_s14  ;;  %p824_p6 = scmp.lt.s32.totalorder %s815_s14, %s815_s14 }
  0x20   : > { %p818_p9 = pnand %p816_p7, %p804_p12  ;;  %p825_p4 = por %p824_p6, %p823_p2 }
  0x22   : > { %p819_p1 = pneg %p818_p9 }
  0x24   : > { %p826_p8 = pnand %p825_p4, %p819_p1 }
  0x26   : > { %829 = shalt.err (!%p826_p8)
}
  0x27   : > { %s962_s15 = smov 128   ;;  %s963_s16 = smov 8  }
  0x28   : > { %745 = dma.hbm_to_vmem [thread:$0]  (!%p1047_p10), %s1249_s1, 2048, %s176_s28, [#allocation6], %s962_s15, %s962_s15, %s963_s16  }
  0x29   : > { %s830_s7 = scalar_lea.hbm %s1251_s3, 2048 }
  0x2a   : > { %p831_p11 = scmp.ne.s32.totalorder %s1251_s3, %s830_s7  ;;  %p837_p4 = scmp.lt.u32.totalorder %s830_s7, %s1251_s3 }
  0x2c   : > { %p833_p1 = pnand %p831_p11, %p804_p12 }
  0x2e   : > { %p834_p2 = pneg %p833_p1 }
  0x30   : > { %p839_p6 = pnand %p837_p4, %p834_p2 }
  0x32   : > { %842 = shalt.err (!%p839_p6)
}
  0x33   : > { %s843_s28 = scalar_lea.vmem %s1051_s6, 2048  ;;  %p851_p3 = scmp.lt.s32.totalorder %s1051_s6, %s1051_s6 }
  0x34   : > { %p844_p8 = scmp.ne.s32.totalorder %s1051_s6, %s843_s28  ;;  %p852_p5 = scmp.lt.s32.totalorder %s843_s28, %s843_s28 }
  0x36   : > { %p846_p13 = pnand %p844_p8, %p804_p12  ;;  %p853_p7 = por %p852_p5, %p851_p3 }
  0x38   : > { %p847_p0 = pneg %p846_p13 }
  0x3a   : > { %p854_p9 = pnand %p853_p7, %p847_p0 }
  0x3c   : > { %857 = shalt.err (!%p854_p9)
}
  0x3d   : > { %748 = dma.hbm_to_vmem [thread:$0]  (!%p1047_p10), %s1251_s3, 2048, %s1051_s6, [#allocation6], %s962_s15, %s962_s15, %s963_s16  }
  0x3e   : > { %s1101_s14 = sadd.s32 1, %s958_s21   ;;  %s29_s29 = sadd.s32 1, %s954_s20 }
  0x3f   : > { %s26_s17 = ssub.s32 %s958_s21, %s1101_s14  ;;  %p36_p12 = scmp.ne.s32.totalorder %s954_s20, %s950_s19 }
  0x40   : > { %p27_p11 = scmp.eq.s32.totalorder %s26_s17, 0  ;;  %p37_p1 = scmp.eq.s32.totalorder %s958_s21, 0 }
  0x41   : > { %p1261_p2 = scmp.eq.s32.totalorder %s1020_s22, 2  ;;  %p759_p6 = scmp.lt.s32.totalorder %s958_s21, 3 }
  0x42   : > { %s1117_s27 = scalar_select %p27_p11, %s954_s20, %s29_s29  }
  0x43   : > { %p1111_p4 = por %p1261_p2, %p36_p12  ;;  %p38_p8 = por %p37_p1, %p36_p12 }
  0x44   : > { %s208_s30 = sand.u32 1, %s954_s20   ;;  %s566_s6 = sshll.u32 %s958_s21, 7 }
  0x45   : > { %s565_s7 = sshll.u32 %s208_s30, 3  ;;  %s1124_s8 = scalar_lea.hbm %s1248_s0, %s566_s6 }
  0x46   : > { %s212_s9 = scalar_lea.vmem [#allocation2], %s565_s7  ;;  %p1128_p10 = pnand %p759_p6, %p38_p8 }
  0x47   : > { %s219_s10 = sshll.u32 %s212_s9, 4  ;;  %s209_s28 = scalar_lea.sflag [#allocation3], %s208_s30  ;;  %s1126_s10 = int_to_ptr.vmem [resolvable:$true] %s219_s10 }
  0x48   : > { %s858_s12 = scalar_lea.hbm %s1124_s8, 128  ;;  %p860_p0 = pneg %p1128_p10 }
  0x49   : > { %p859_p13 = scmp.ne.s32.totalorder %s1124_s8, %s858_s12  ;;  %s863_s17 = scalar_lea.hbm %s1248_s0, 384 }
  0x4a   : > { %p864_p7 = scmp.lt.u32.totalorder %s1124_s8, %s1248_s0  ;;  %p865_p9 = scmp.lt.u32.totalorder %s863_s17, %s858_s12 }
  0x4b   : > { %p861_p3 = pnand %p860_p0, %p859_p13  ;;  %p867_p11 = scmp.lt.u32.totalorder %s858_s12, %s1124_s8 }
  0x4c   : > { %p866_p12 = por %p865_p9, %p864_p7 }
  0x4d   : > { %p862_p5 = pneg %p861_p3 }
  0x4e   : > { %p868_p1 = por %p867_p11, %p866_p12 }
  0x50   : > { %p869_p2 = pnand %p868_p1, %p862_p5 }
  0x52   : > { %872 = shalt.err (!%p869_p2)
}
  0x53   : > { %s873_s30 = scalar_lea.vmem %s1126_s10, 128  ;;  %s964_s15 = smov [#allocation2]  }
  0x54   : > { %p874_p6 = scmp.ne.s32.totalorder %s1126_s10, %s873_s30  ;;  %s878_s16 = sshll.u32 %s964_s15, 4  ;;  %s879_s16 = int_to_ptr.vmem [resolvable:$false] %s878_s16 }
  0x55   : > { %s880_s9 = scalar_lea.vmem %s879_s16, 256  ;;  %p881_p3 = scmp.lt.s32.totalorder %s1126_s10, %s879_s16 }
  0x56   : > { %p876_p8 = pnand %p874_p6, %p860_p0  ;;  %p882_p7 = scmp.lt.s32.totalorder %s880_s9, %s873_s30 }
  0x58   : > { %p877_p13 = pneg %p876_p8  ;;  %p883_p9 = por %p882_p7, %p881_p3 }
  0x5a   : > { %p884_p12 = pnand %p883_p9, %p877_p13 }
  0x5c   : > { %887 = shalt.err (!%p884_p12)
}
  0x5d   : > { %752 = dma.hbm_to_vmem [thread:$0]  (!%p1128_p10), %s1124_s8, 128, %s1126_s10, %s209_s28  }
  0x5e   : > { %p1264_p5 = scmp.ne.s32.totalorder %s1259_s26, 0 }
  0x5f   : > { %s1160_s12 = sand.u32 (!%p1264_p5), 1, %s950_s19   ;;  %p1265_p0 = scmp.ne.s32.totalorder (!%p1264_p5), %s1257_s24, 0 }
  0x60   : > { %228 = sbr.rel (%p1264_p5) target bundleno = 583 (0x247), region = 40  ;;  %s568_s13 = sshll.u32 (!%p1264_p5), %s1160_s12, 3 }
  0x61   : > { %s231_s29 = scalar_lea.sflag (!%p1264_p5), [#allocation3], %s1160_s12  ;;  %s1166_s17 = scalar_lea.vmem (!%p1264_p5), [#allocation2], %s568_s13 }
  0x67   : > { %933 = dma.done.wait (%p1265_p0), %s231_s29, 128  }
  0x68   : > { %935 = vsyncadd (%p1265_p0), %s231_s29, 4294967168  ;;  %p1266_p10 = scmp.eq.s32.totalorder %s1020_s22, 0 }
  0x6a   : > { %937 = dma.done.wait (%p1266_p10), [#allocation6], 4096   ;;  %p1267_p11 = pmov %p1266_p10 }
  0x6b   : > { %v965_v0 = vmov 0.0|0.0   ;;  %vm966_vm0 = vmmov 0   ;;  %v967_v1 = vmov 0.0   ;;  %v270_v2 = vld [vmem:[#allocation5] sm:$0xff]  ;;  %v271_v3 = vld [vmem:[#allocation5 + $0x8] sm:$0xff]  ;;  %v272_v4 = vld [vmem:[#allocation5 + $0x10] sm:$0xff] }
  0x6c   : > { %939 = vsyncadd (%p1267_p11), [#allocation6], 4294963200  ;;  %682 = vmatprep.subr.bf16.mxu0 %v965_v0  ;;  %644 = vmatprep.mubr.msk.f32.mxu0 %vm966_vm0, %v967_v1  ;;  %v683_v5 = vpack.c.bf16 %v271_v3, %v270_v2  ;;  %v273_v6 = vld [vmem:[#allocation5 + $0x18] sm:$0xff]  ;;  %v274_v8 = vld [vmem:[#allocation5 + $0x20] sm:$0xff]  ;;  %s575_s11 = sshll.u32 %s1020_s22, 7  ;;  %s268_s28 = scalar_lea.vmem [#allocation8], %s568_s13 }
  0x6d   : > { %706 = vmatprep.subr.bf16.mxu1 %v965_v0  ;;  %679 = vmatprep.mubr.msk.f32.mxu1 %vm966_vm0, %v967_v1  ;;  %v686_v7 = vpack.c.bf16 %v273_v6, %v272_v4  ;;  %v275_v9 = vld [vmem:[#allocation5 + $0x28] sm:$0xff]  ;;  %v363_v10 = vld [vmem:[#allocation7] sm:$0xff]  ;;  %v365_v12 = vld [vmem:[#allocation7 + $0x10] sm:$0xff]  ;;  %s471_s7 = sshll.u32 %s268_s28, 4  ;;  %s1205_s15 = scalar_lea.hbm %s1253_s5, %s575_s11  ;;  %s1207_s7 = int_to_ptr.vmem [resolvable:$true] %s471_s7 }
  0x6e   : > { %684 = vmatpush3.bf16.msra.mxu0 %v683_v5  ;;  %v364_v11 = vld [vmem:[#allocation7 + $0x8] sm:$0xff]  ;;  %v366_v13 = vld [vmem:[#allocation7 + $0x18] sm:$0xff]  ;;  %v689_v14 = vpack.c.bf16 %v275_v9, %v274_v8  ;;  %v276_v16 = vld [vmem:[#allocation5 + $0x30] sm:$0xff]  ;;  %s458_s16 = scalar_lea.sflag [#allocation4], %s1160_s12  ;;  %s888_s9 = scalar_lea.vmem %s1207_s7, 128 }
  0x6f   : > { %685 = vmatprep.subr.bf16.mxu0 %v965_v0  ;;  %v707_v15 = vpack.c.bf16 %v364_v11, %v363_v10  ;;  %v277_v17 = vld [vmem:[#allocation5 + $0x38] sm:$0xff]  ;;  %v710_v18 = vpack.c.bf16 %v366_v13, %v365_v12  ;;  %v367_v19 = vld [vmem:[#allocation7 + $0x20] sm:$0xff]  ;;  %v368_v20 = vld [vmem:[#allocation7 + $0x28] sm:$0xff]  ;;  %p889_p1 = scmp.ne.s32.totalorder %s1207_s7, %s888_s9  ;;  %s968_s22 = smov [#allocation8]  }
  0x70   : > { %v692_v21 = vpack.c.bf16 %v277_v17, %v276_v16  ;;  %v278_v22 = vld [vmem:[#allocation5 + $0x40] sm:$0xff]  ;;  %v279_v23 = vld [vmem:[#allocation5 + $0x48] sm:$0xff]  ;;  %v713_v24 = vpack.c.bf16 %v368_v20, %v367_v19  ;;  %v369_v25 = vld [vmem:[#allocation7 + $0x30] sm:$0xff]  ;;  %s892_s13 = sshll.u32 %s968_s22, 4  ;;  %s893_s13 = int_to_ptr.vmem [resolvable:$false] %s892_s13 }
  0x71   : > { %708 = vmatpush3.bf16.msra.mxu1 %v707_v15  ;;  %v370_v26 = vld [vmem:[#allocation7 + $0x38] sm:$0xff]  ;;  %v695_v27 = vpack.c.bf16 %v279_v23, %v278_v22  ;;  %v280_v28 = vld [vmem:[#allocation5 + $0x50] sm:$0xff]  ;;  %v371_v31 = vld [vmem:[#allocation7 + $0x40] sm:$0xff]  ;;  %p890_p2 = pnand %p889_p1, %p1111_p4  ;;  %s894_s29 = scalar_lea.vmem %s893_s13, 256 }
  0x72   : > { %687 = vmatpush3.bf16.msra.mxu0 %v686_v7  ;;  %709 = vmatprep.subr.bf16.mxu1 %v965_v0  ;;  %v281_v29 = vld [vmem:[#allocation5 + $0x58] sm:$0xff]  ;;  %v716_v30 = vpack.c.bf16 %v370_v26, %v369_v25  ;;  %v372_v32 = vld [vmem:[#allocation7 + $0x48] sm:$0xff]  ;;  %v282_v34 = vld [vmem:[#allocation5 + $0x60] sm:$0xff]  ;;  %p895_p8 = scmp.lt.s32.totalorder %s1207_s7, %s893_s13  ;;  %p896_p13 = scmp.lt.s32.totalorder %s894_s29, %s888_s9 }
  0x73   : > { %688 = vmatprep.subr.bf16.mxu0 %v965_v0  ;;  %v698_v33 = vpack.c.bf16 %v281_v29, %v280_v28  ;;  %v283_v35 = vld [vmem:[#allocation5 + $0x68] sm:$0xff]  ;;  %v719_v36 = vpack.c.bf16 %v372_v32, %v371_v31  ;;  %v373_v37 = vld [vmem:[#allocation7 + $0x50] sm:$0xff]  ;;  %v374_v38 = vld [vmem:[#allocation7 + $0x58] sm:$0xff]  ;;  %p891_p6 = pneg %p890_p2 }
  0x74   : > { %v701_v39 = vpack.c.bf16 %v283_v35, %v282_v34  ;;  %v284_v40 = vld [vmem:[#allocation5 + $0x70] sm:$0xff]  ;;  %v285_v41 = vld [vmem:[#allocation5 + $0x78] sm:$0xff]  ;;  %v722_v42 = vpack.c.bf16 %v374_v38, %v373_v37  ;;  %v375_v43 = vld [vmem:[#allocation7 + $0x60] sm:$0xff]  ;;  %p897_p3 = por %p896_p13, %p895_p8 }
  0x75   : > { %711 = vmatpush3.bf16.msra.mxu1 %v710_v18  ;;  %v376_v44 = vld [vmem:[#allocation7 + $0x68] sm:$0xff]  ;;  %v704_v45 = vpack.c.bf16 %v285_v41, %v284_v40  ;;  %v269_v47 = vld [vmem:[%s1166_s17] sm:$0xff] }
  0x76   : > { %690 = vmatpush3.bf16.msra.mxu0 %v689_v14  ;;  %712 = vmatprep.subr.bf16.mxu1 %v965_v0  ;;  %v725_v46 = vpack.c.bf16 %v376_v44, %v375_v43  ;;  %v377_v48 = vld [vmem:[#allocation7 + $0x70] sm:$0xff]  ;;  %v378_v49 = vld [vmem:[#allocation7 + $0x78] sm:$0xff]  ;;  %p898_p7 = pnand %p897_p3, %p891_p6 }
  0x77   : > { %691 = vmatprep.subr.bf16.mxu0 %v965_v0  ;;  %v728_v50 = vpack.c.bf16 %v378_v49, %v377_v48  ;;  %v572_v51 = vld [vmem:[%s1250_s2] ss:$0 sm:$0xff] }
  0x78   : > { %v573_v55 = vld [vmem:[%s1252_s4] ss:$0 sm:$0xff] }
  0x79   : > { %714 = vmatpush3.bf16.msra.mxu1 %v713_v24 }
  0x7a   : > { %693 = vmatpush3.bf16.msra.mxu0 %v692_v21  ;;  %715 = vmatprep.subr.bf16.mxu1 %v965_v0 }
  0x7b   : > { %694 = vmatprep.subr.bf16.mxu0 %v965_v0 }
  0x7d   : > { %717 = vmatpush3.bf16.msra.mxu1 %v716_v30 }
  0x7e   : > { %696 = vmatpush3.bf16.msra.mxu0 %v695_v27  ;;  %718 = vmatprep.subr.bf16.mxu1 %v965_v0 }
  0x7f   : > { %697 = vmatprep.subr.bf16.mxu0 %v965_v0 }
  0x81   : > { %720 = vmatpush3.bf16.msra.mxu1 %v719_v36 }
  0x82   : > { %699 = vmatpush3.bf16.msra.mxu0 %v698_v33  ;;  %721 = vmatprep.subr.bf16.mxu1 %v965_v0 }
  0x83   : > { %700 = vmatprep.subr.bf16.mxu0 %v965_v0 }
  0x85   : > { %723 = vmatpush3.bf16.msra.mxu1 %v722_v42 }
  0x86   : > { %702 = vmatpush3.bf16.msra.mxu0 %v701_v39  ;;  %724 = vmatprep.subr.bf16.mxu1 %v965_v0 }
  0x87   : > { %703 = vmatprep.subr.bf16.mxu0 %v965_v0 }
  0x89   : > { %726 = vmatpush3.bf16.msra.mxu1 %v725_v46 }
  0x8a   : > { %705 = vmatpush3.bf16.msra.mxu0 %v704_v45  ;;  %727 = vmatprep.subr.bf16.mxu1 %v965_v0 }
  0x8d   : > { %645 = vmatmul.mubr.f32.vlgmr.msra.gmra.mrb[0].mxu0 %v269_v47  ;;  %729 = vmatpush3.bf16.msra.mxu1 %v728_v50 }
 0x160   : > { %v359_v52 = vpop.f32.mrb[0].mxu0 }
 0x161   : > { %v360_v53 = vadd.f32 %v572_v51, %v359_v52  ;;  %v646_v54 = vpop.f32.mrb[1].mxu0 }
 0x163   : > { %680 = vmatmul.mubr.f32.vlgmr.msra.gmra.mrb[0].mxu1 %v360_v53 }
 0x236   : > { %v452_v56 = vpop.f32.mrb[0].mxu1 }
 0x237   : > { %v453_v57 = vadd.f32 %v573_v55, %v452_v56  ;;  %v681_v58 = vpop.f32.mrb[1].mxu1 }
 0x239   : > { %456 = vst [vmem:[%s268_s28] sm:$0xff] %v453_v57 }
 0x23a   : > { %901 = shalt.err (!%p898_p7)
}
 0x23b   : > { %s902_s12 = scalar_lea.hbm %s1205_s15, 128  ;;  %s906_s26 = scalar_lea.hbm %s1253_s5, 384 }
 0x23c   : > { %p903_p9 = scmp.ne.s32.totalorder %s1205_s15, %s902_s12  ;;  %p907_p0 = scmp.lt.u32.totalorder %s1205_s15, %s1253_s5 }
 0x23d   : > { %p908_p10 = scmp.lt.u32.totalorder %s906_s26, %s902_s12  ;;  %p910_p1 = scmp.lt.u32.totalorder %s902_s12, %s1205_s15 }
 0x23e   : > { %p904_p12 = pnand %p903_p9, %p1111_p4 }
 0x23f   : > { %p909_p11 = por %p908_p10, %p907_p0 }
 0x240   : > { %p905_p5 = pneg %p904_p12 }
 0x241   : > { %p911_p2 = por %p910_p1, %p909_p11 }
 0x243   : > { %p912_p6 = pnand %p911_p2, %p905_p5 }
 0x245   : > { %915 = shalt.err (!%p912_p6)
}
 0x246   : > { %740 = dma.vmem_to_hbm [thread:$0]  (%p1111_p4), %s1207_s7, 128, %s1205_s15, %s458_s16  }
 0x247 PF: > { %p762_p8 = scmp.ge.s32.totalorder %s958_s21, 2  ;;  %s483_s11 = sand.u32 1, %s946_s18  }
 0x248   : > { %p1268_p13 = scmp.ne.s32.totalorder %s1258_s25, 0  ;;  %s484_s28 = scalar_lea.sflag [#allocation4], %s483_s11 }
 0x24a   : > { %p754_p3 = pnand %p762_p8, %p1268_p13 }
 0x24c   : > { %941 = dma.done.wait (!%p754_p3), %s484_s28, 128  }
 0x24d   : > { %943 = vsyncadd (!%p754_p3), %s484_s28, 4294967168  ;;  %p19_p7 = scmp.ge.s32.totalorder %s1101_s14, 5   ;;  %s1269_s18 = smov %s950_s19 }
 0x24e   : > { %s1270_s19 = smov %s954_s20  ;;  %s1271_s20 = smov %s1117_s27 }
 0x24f   : > { %s1272_s21 = smov %s1101_s14  ;;  %21 = sbr.rel (!%p19_p7) target bundleno = 6 (0x6), region = 93 }
 0x256   :  { %489 = vsyncpa [#allocation3], 1 }
 0x257   :  { %491 = vsyncpa [#allocation3 + $0x1], 1 }
 0x258   :  { %492 = vsyncpa [#allocation6], 1 }
 0x259   :  { %493 = vsyncpa [#allocation4], 1 }
 0x25a   :  { %495 = vsyncpa [#allocation4 + $0x1], 1 }

</bundles_post_ra>
